<compile_context>
chip_gen: v7x
topology: tpu7x:2x2x1
jax: 0.10.0
libtpu: 0.0.40
codegen_flags: <defaults>
</compile_context>

<pallas_src>
import functools

import jax
import jax.numpy as jnp
from jax.experimental import pallas as pl
from jax.experimental.pallas import tpu as pltpu

EPS = 1e-5


def _round_up(n, m):
    return ((n + m - 1) // m) * m


# ---------------------------------------------------------------------------
# One-time parameter fusion (hoisted out of the hot path).
# ---------------------------------------------------------------------------
def prepare_params(params, *, output_layer=True, weight_dtype=jnp.bfloat16):
    """Fold BatchNorm (eval) + Linear bias into fused weights / shifts."""
    weights = []
    shifts = []
    dims = []
    for (w, b, gamma, beta, mean, var) in params["hidden"]:
        scale = gamma / jnp.sqrt(var + EPS)                       # (dout,)
        weights.append((w * scale[None, :]).astype(weight_dtype)) # fold scale into W
        shifts.append(((b - mean) * scale + beta).reshape(1, -1).astype(jnp.float32))
        dims.append(int(w.shape[1]))

    fused = {
        "weights": weights,
        "dims": tuple(dims),
        "output_layer": bool(output_layer),
    }
    if output_layer:
        fused["w_out_row"] = params["w_out"].reshape(1, -1).astype(jnp.float32)
        shifts.append(params["b_out"].reshape(1, 1).astype(jnp.float32))
    fused["shifts"] = jnp.concatenate(shifts, axis=1)             # (1, sum(dout) [+1])
    return fused


# ---------------------------------------------------------------------------
# Single fused kernel: whole MLP forward for one batch tile.
# ---------------------------------------------------------------------------
def _mlp_fused_kernel(x_ref, *refs, hidden_dims, has_output):
    # refs layout: w_0 ... w_{L-1}, [w_out_row], shifts, o_ref
    o_ref = refs[-1]
    shifts = refs[-2][...]                                        # (1, total) f32

    h = x_ref[...].astype(jnp.float32)                            # (TB, in_dim)
    off = 0
    for li, d in enumerate(hidden_dims):                          # static unroll
        w = refs[li][...]                                         # (din, d), bf16, BN folded
        sh = shifts[:, off:off + d]                               # (1, d), bias+BN folded
        off += d
        h = jnp.dot(h.astype(w.dtype), w,
                    preferred_element_type=jnp.float32) + sh      # MXU + VPU add
        h = jnp.maximum(h, 0.0)                                   # ReLU
        # Dropout: identity (eval mode).

    if has_output:
        w_out = refs[len(hidden_dims)][...]                       # (1, d_last) f32
        b_out = shifts[:, off:off + 1]                            # (1, 1)
        # VPU multiply + lane reduction instead of a 1-lane MXU matmul.
        h = jnp.sum(h * w_out, axis=-1, keepdims=True) + b_out    # (TB, 1)

    o_ref[...] = h.astype(o_ref.dtype)


# ---------------------------------------------------------------------------
# Wrapper: batch-tiled grid, weights resident in VMEM across the grid.
# ---------------------------------------------------------------------------
def mlp_forward(x, fused, *, block_b=256):
    """x: (B, input_dim) or (input_dim,) -> (B, 1) (or (B, d_last) if no output layer)."""
    if x.ndim == 1:                      # mirrors torch's `x.unsqueeze(0)`
        x = x[None, :]
    x = x.astype(jnp.float32)
    B, in_dim = x.shape

    hidden_dims = fused["dims"]
    has_output = fused["output_layer"]
    out_dim = 1 if has_output else hidden_dims[-1]

    tb = min(block_b, _round_up(B, 8))   # batch tile (multiple of 8 sublanes)
    grid = (pl.cdiv(B, tb),)

    operands = [x] + list(fused["weights"])
    if has_output:
        operands.append(fused["w_out_row"])
    operands.append(fused["shifts"])

    def const_spec(a):                   # full-array, constant block index -> VMEM-resident
        return pl.BlockSpec(tuple(a.shape), lambda i: tuple(0 for _ in a.shape))

    in_specs = [pl.BlockSpec((tb, in_dim), lambda i: (i, 0))]
    in_specs += [const_spec(a) for a in operands[1:]]
    out_specs = pl.BlockSpec((tb, out_dim), lambda i: (i, 0))

    # Cost estimate (helps XLA schedule around the custom call).
    dims_seq = (in_dim,) + hidden_dims
    flops = sum(2 * B * a * b for a, b in zip(dims_seq[:-1], dims_seq[1:]))
    if has_output:
        flops += 2 * B * hidden_dims[-1]
    out_bytes = B * out_dim * 4
    bytes_accessed = sum(int(a.size) * a.dtype.itemsize for a in operands) + out_bytes

    # Explicit VMEM budget: resident weights/shifts + double-buffered x/out
    # tiles + activation slack.
    resident = sum(int(a.size) * a.dtype.itemsize for a in operands[1:])
    tile_io = 2 * (tb * in_dim + tb * out_dim) * 4
    act = 2 * tb * max(dims_seq) * 4
    vmem_limit = int(min(100 << 20, max(8 << 20, 2 * (resident + tile_io + act))))

    kern = functools.partial(_mlp_fused_kernel,
                             hidden_dims=hidden_dims,
                             has_output=has_output)

    return pl.pallas_call(
        kern,
        out_shape=jax.ShapeDtypeStruct((B, out_dim), jnp.float32),
        grid=grid,
        in_specs=in_specs,
        out_specs=out_specs,
        compiler_params=pltpu.CompilerParams(
            dimension_semantics=("parallel",),
            vmem_limit_bytes=vmem_limit),
        cost_estimate=pl.CostEstimate(
            flops=flops, transcendentals=0, bytes_accessed=bytes_accessed),
    )(*operands)


# ---------------------------------------------------------------------------
# Parameter construction (deterministic, mirrors nn.Module __init__ shapes)
# ---------------------------------------------------------------------------
def make_params(key, input_dim, embed_dims, output_layer=True):
    params = {"hidden": []}
    dim = input_dim
    for embed_dim in embed_dims:
        key, kw, kb, kg, kbe, km, kv = jax.random.split(key, 7)
        w = jax.random.normal(kw, (dim, embed_dim), jnp.float32) / jnp.sqrt(float(dim))
        b = 0.1 * jax.random.normal(kb, (embed_dim,), jnp.float32)
        gamma = 1.0 + 0.1 * jax.random.normal(kg, (embed_dim,), jnp.float32)
        beta = 0.1 * jax.random.normal(kbe, (embed_dim,), jnp.float32)
        mean = 0.1 * jax.random.normal(km, (embed_dim,), jnp.float32)
        var = jax.random.uniform(kv, (embed_dim,), jnp.float32, minval=0.5, maxval=1.5)
        params["hidden"].append((w, b, gamma, beta, mean, var))
        dim = embed_dim
    if output_layer:
        key, kw, kb = jax.random.split(key, 3)
        params["w_out"] = jax.random.normal(kw, (dim, 1), jnp.float32) / jnp.sqrt(float(dim))
        params["b_out"] = 0.1 * jax.random.normal(kb, (1,), jnp.float32)
    return params


# ---------------------------------------------------------------------------
# Pure-JAX references
# ---------------------------------------------------------------------------
def ref_forward(x, params, *, output_layer=True):
    """Torch-equivalent eval-mode forward in f32 (semantic reference)."""
    if x.ndim == 1:
        x = x[None, :]
    h = x
    for (w, b, gamma, beta, mean, var) in params["hidden"]:
        z = h @ w + b                                           # Linear
        z = gamma * (z - mean) / jnp.sqrt(var + EPS) + beta     # BatchNorm1d (eval)
        h = jnp.maximum(z, 0.0)                                 # ReLU; Dropout = id (eval)
    if output_layer:
        h = h @ params["w_out"] + params["b_out"]               # output Linear -> (B, 1)
    return h


def ref_forward_fused(x, fused):
    """Reference using the same fused bf16 weights as the kernel (tight check)."""
    if x.ndim == 1:
        x = x[None, :]
    h = x.astype(jnp.float32)
    shifts = fused["shifts"]
    off = 0
    for li, d in enumerate(fused["dims"]):
        w = fused["weights"][li]
        h = jnp.dot(h.astype(w.dtype), w,
                    preferred_element_type=jnp.float32) + shifts[:, off:off + d]
        h = jnp.maximum(h, 0.0)
        off += d
    if fused["output_layer"]:
        h = jnp.sum(h * fused["w_out_row"], axis=-1, keepdims=True) + shifts[:, off:off + 1]
    return h


if __name__ == "__main__":
    input_dim = 16
    embed_dims = (32, 16)
    dropout = 0.5          # unused at eval time
    B = 2

    key = jax.random.PRNGKey(0)
    kx, kp = jax.random.split(key)
    x = jax.random.normal(kx, (B, input_dim), jnp.float32)
    params = make_params(kp, input_dim, embed_dims, output_layer=True)

    # One-time fusion (hoisted out of the hot path).
    fused = prepare_params(params, output_layer=True)

    out = mlp_forward(x, fused)
    out = jax.block_until_ready(out)
    assert out.shape == (B, 1), out.shape

    # Tight check vs. a reference that uses the identical fused bf16 weights.
    ref_f = ref_forward_fused(x, fused)
    assert jnp.allclose(out, ref_f, rtol=2e-3, atol=2e-3), (
        f"fused-ref max abs diff {float(jnp.max(jnp.abs(out - ref_f)))}")

    # Loose check vs. the f32 torch-equivalent forward (bf16 weight rounding).
    ref = ref_forward(x, params, output_layer=True)
    assert jnp.allclose(out, ref, rtol=5e-2, atol=5e-2), (
        f"f32-ref max abs diff {float(jnp.max(jnp.abs(out - ref)))}")

    print("KERNEL_OK")
</pallas_src>

<mosaic_0001>
module attributes {stable_mosaic.version = 11 : i64} {
  func.func @_mlp_fused_kernel(%arg0: i32, %arg1: memref<8x16xf32, #tpu.memory_space<vmem>>, %arg2: memref<16x32xbf16, #tpu.memory_space<vmem>>, %arg3: memref<32x16xbf16, #tpu.memory_space<vmem>>, %arg4: memref<1x16xf32, #tpu.memory_space<vmem>>, %arg5: memref<1x49xf32, #tpu.memory_space<vmem>>, %arg6: memref<8x1xf32, #tpu.memory_space<vmem>>) attributes {dimension_semantics = [#tpu.dimension_semantics<parallel>], iteration_bounds = array<i64: 1>, scalar_prefetch = 0 : i64, scratch_operands = 0 : i64, tpu.core_type = #tpu.core_type<tc>, window_params = [{transform_indices = @transform_0, window_bounds = array<i64: 8, 16>}, {pipeline_mode = #tpu.pipeline_mode<synchronous>, transform_indices = @transform_1, window_bounds = array<i64: 16, 32>}, {pipeline_mode = #tpu.pipeline_mode<synchronous>, transform_indices = @transform_2, window_bounds = array<i64: 32, 16>}, {pipeline_mode = #tpu.pipeline_mode<synchronous>, transform_indices = @transform_3, window_bounds = array<i64: 1, 16>}, {pipeline_mode = #tpu.pipeline_mode<synchronous>, transform_indices = @transform_4, window_bounds = array<i64: 1, 49>}, {transform_indices = @transform_5, window_bounds = array<i64: 8, 1>}]} {
    %c0 = arith.constant 0 : index
    %c0_0 = arith.constant 0 : index
    %0 = vector.load %arg5[%c0, %c0_0] : memref<1x49xf32, #tpu.memory_space<vmem>>, vector<1x49xf32>
    %c0_1 = arith.constant 0 : index
    %c0_2 = arith.constant 0 : index
    %1 = vector.load %arg1[%c0_1, %c0_2] : memref<8x16xf32, #tpu.memory_space<vmem>>, vector<8x16xf32>
    %c0_3 = arith.constant 0 : index
    %c0_4 = arith.constant 0 : index
    %2 = vector.load %arg2[%c0_3, %c0_4] : memref<16x32xbf16, #tpu.memory_space<vmem>>, vector<16x32xbf16>
    %3 = vector.extract_strided_slice %0 {offsets = [0, 0], sizes = [1, 32], strides = [1, 1]} : vector<1x49xf32> to vector<1x32xf32>
    %4 = arith.truncf %1 : vector<8x16xf32> to vector<8x16xbf16>
    %cst = arith.constant dense<0.000000e+00> : vector<8x32xf32>
    %5 = tpu.matmul %4, %2, %cst {dimension_numbers = #tpu.dot_dimension_numbers<[1], [0], [0], [1], [0, 0, 1, 1], [], []>} : vector<8x16xbf16>, vector<16x32xbf16>, vector<8x32xf32> -> vector<8x32xf32>
    %6 = vector.broadcast %3 : vector<1x32xf32> to vector<8x32xf32>
    %7 = arith.addf %5, %6 : vector<8x32xf32>
    %cst_5 = arith.constant 0.000000e+00 : f32
    %8 = vector.broadcast %cst_5 : f32 to vector<8x32xf32>
    %9 = arith.maximumf %7, %8 : vector<8x32xf32>
    %c0_6 = arith.constant 0 : index
    %c0_7 = arith.constant 0 : index
    %10 = vector.load %arg3[%c0_6, %c0_7] : memref<32x16xbf16, #tpu.memory_space<vmem>>, vector<32x16xbf16>
    %11 = vector.extract_strided_slice %0 {offsets = [0, 32], sizes = [1, 16], strides = [1, 1]} : vector<1x49xf32> to vector<1x16xf32>
    %12 = arith.truncf %9 : vector<8x32xf32> to vector<8x32xbf16>
    %cst_8 = arith.constant dense<0.000000e+00> : vector<8x16xf32>
    %13 = tpu.matmul %12, %10, %cst_8 {dimension_numbers = #tpu.dot_dimension_numbers<[1], [0], [0], [1], [0, 0, 1, 1], [], []>} : vector<8x32xbf16>, vector<32x16xbf16>, vector<8x16xf32> -> vector<8x16xf32>
    %14 = vector.broadcast %11 : vector<1x16xf32> to vector<8x16xf32>
    %15 = arith.addf %13, %14 : vector<8x16xf32>
    %cst_9 = arith.constant 0.000000e+00 : f32
    %16 = vector.broadcast %cst_9 : f32 to vector<8x16xf32>
    %17 = arith.maximumf %15, %16 : vector<8x16xf32>
    %c0_10 = arith.constant 0 : index
    %c0_11 = arith.constant 0 : index
    %18 = vector.load %arg4[%c0_10, %c0_11] : memref<1x16xf32, #tpu.memory_space<vmem>>, vector<1x16xf32>
    %19 = vector.extract_strided_slice %0 {offsets = [0, 48], sizes = [1, 1], strides = [1, 1]} : vector<1x49xf32> to vector<1x1xf32>
    %20 = vector.broadcast %18 : vector<1x16xf32> to vector<8x16xf32>
    %21 = arith.mulf %17, %20 : vector<8x16xf32>
    %cst_12 = arith.constant dense<0.000000e+00> : vector<8xf32>
    %22 = vector.multi_reduction <add>, %21, %cst_12 [1] : vector<8x16xf32> to vector<8xf32>
    %23 = vector.shape_cast %22 : vector<8xf32> to vector<8x1xf32>
    %24 = vector.broadcast %19 : vector<1x1xf32> to vector<8x1xf32>
    %25 = arith.addf %23, %24 : vector<8x1xf32>
    %c0_13 = arith.constant 0 : index
    %c0_14 = arith.constant 0 : index
    %26 = vector.load %arg6[%c0_13, %c0_14] : memref<8x1xf32, #tpu.memory_space<vmem>>, vector<8x1xf32>
    tpu.vector_store %arg6[%c0_13, %c0_14], %25 {strides = array<i32>} : memref<8x1xf32, #tpu.memory_space<vmem>>, vector<8x1xf32>,
    return
  }
  func.func @transform_0(%arg0: i32) -> (i32, i32) {
    %c0_i32 = arith.constant 0 : i32
    %c0_i32_0 = arith.constant 0 : i32
    return %arg0, %c0_i32 : i32, i32
  }
  func.func @transform_1(%arg0: i32) -> (i32, i32) {
    %c0_i32 = arith.constant 0 : i32
    %c0_i32_0 = arith.constant 0 : i32
    %c0_i32_1 = arith.constant 0 : i32
    return %c0_i32, %c0_i32_0 : i32, i32
  }
  func.func @transform_2(%arg0: i32) -> (i32, i32) {
    %c0_i32 = arith.constant 0 : i32
    %c0_i32_0 = arith.constant 0 : i32
    %c0_i32_1 = arith.constant 0 : i32
    return %c0_i32, %c0_i32_0 : i32, i32
  }
  func.func @transform_3(%arg0: i32) -> (i32, i32) {
    %c0_i32 = arith.constant 0 : i32
    %c0_i32_0 = arith.constant 0 : i32
    %c0_i32_1 = arith.constant 0 : i32
    return %c0_i32, %c0_i32_0 : i32, i32
  }
  func.func @transform_4(%arg0: i32) -> (i32, i32) {
    %c0_i32 = arith.constant 0 : i32
    %c0_i32_0 = arith.constant 0 : i32
    %c0_i32_1 = arith.constant 0 : i32
    return %c0_i32, %c0_i32_0 : i32, i32
  }
  func.func @transform_5(%arg0: i32) -> (i32, i32) {
    %c0_i32 = arith.constant 0 : i32
    %c0_i32_0 = arith.constant 0 : i32
    return %arg0, %c0_i32 : i32, i32
  }
}

</mosaic_0001>

<bundles_post_ra>
// kernel: tpu_custom_call.1
= control target key start
LH: loop header
LB: loop body
LE: loop exit
PB: predicated region body
PF: predicated region fallthrough
CT: control target
= control target key end

     0   :  { %v238_v1 = vmov 0.0   ;;  %vm38_vm0 = vcmask 130048   ;;  %vm239_vm1 = vmmov 0   ;;  %s240_s26 = smov 96   ;;  %vm103_vm2 = vcmask 261120   ;;  %s295_s0 = inlined_call_operand.vmem [shape: f32[2,16], index: 0, kind: input, shape index: {}]   ;;  %s296_s1 = inlined_call_operand.vmem [shape: bf16[16,32], index: 1, kind: input, shape index: {}]   ;;  %s297_s2 = inlined_call_operand.vmem [shape: bf16[32,16], index: 2, kind: input, shape index: {}]   ;;  %s298_s3 = inlined_call_operand.vmem [shape: f32[1,16], index: 3, kind: input, shape index: {}]   ;;  %s299_s4 = inlined_call_operand.vmem [shape: f32[1,49], index: 4, kind: input, shape index: {}]   ;;  %s300_s5 = inlined_call_operand.vmem [shape: f32[2,1], index: 5, kind: output, shape index: {}]  }
   0x1   :  { %v235_v0 = vld [vmem:[%s296_s1] sm:$0xff]   ;;  %217 = vmatprep.subr.bf16.mxu0 %v238_v1  ;;  %223 = vmatprep.subr.bf16.mxu1 %v238_v1  ;;  %v237_v5 = vld [vmem:[%s297_s2 + $0x8] sm:$0xff]   ;;  %vm164_vm3 = vcmask 7168  }
   0x2   :  { %v22_v2 = vld [vmem:[%s295_s0] sm:$0xff]  ;;  %218 = vmatpush3.bf16.msra.mxu0 %v235_v0  ;;  %219 = vmatprep.mubr.msk.bf16.mxu0 %vm239_vm1, %v238_v1 }
   0x3   :  { %v25_v3 = vpack.c.bf16 %v22_v2, %v22_v2  ;;  %227 = vmatprep.mubr.msk.bf16.mxu1 %vm239_vm1, %v238_v1  ;;  %v236_v4 = vld [vmem:[%s297_s2] sm:$0xff]  }
   0x4   :  { %224 = vmatpush3.bf16.msra.mxu1 %v236_v4  ;;  %v205_v6 = vld [vmem:[%s299_s4] ss:$0 sm:$0xff]  ;;  %s241_s4 = smov 80  }
   0x5   :  { %220 = vmatmul.mubr.msk.bf16.vlgmr.msra.gmra.mrb[0].mxu0 %vm38_vm0, %v25_v3  ;;  %225 = vmatprep.subr.bf16.mxu1 %v238_v1  ;;  %v211_v19 = vld [vmem:[%s298_s3] ss:$0 sm:$0xff] }
   0x6   :  { %100 = vrot.lane.b32.xlu0 %v205_v6, %s240_s26 }
   0x8   :  { %226 = vmatpush3.bf16.msra.mxu1 %v237_v5 }
  0x78   :  { %v101_v14 = vpop.permute.xlu0 %100 }
  0xd8   :  { %v76_v7 = vpop.f32.mrb[0].mxu0 }
  0xd9   :  { %v77_v8 = vadd.f32 %v205_v6, %v76_v7  ;;  %v221_v9 = vpop.f32.mrb[1].mxu0 }
  0xda   :  { %v79_v10 = vpop.f32.mrb[2].mxu0 }
  0xdb   :  { %v82_v11 = vmax.f32 %v77_v8, 0.0  ;;  %v222_v12 = vpop.f32.mrb[3].mxu0 }
  0xdd   :  { %v87_v13 = vpack.c.bf16 %v82_v11, %v82_v11 }
  0xdf   :  { %228 = vmatmul.mubr.msk.bf16.vlgmr.msra.gmra.mrb[0].mxu1 %vm103_vm2, %v87_v13 }
 0x1b2   :  { %v141_v15 = vpop.f32.mrb[0].mxu1 }
 0x1b3   :  { %v142_v16 = vadd.f32 %v141_v15, %v101_v14  ;;  %v229_v17 = vpop.f32.mrb[1].mxu1 }
 0x1b4   :  { %v144_v18 = vpop.f32.mrb[2].mxu1 }
 0x1b5   :  { %v147_v20 = vmax.f32 %v142_v16, 0.0  ;;  %v230_v21 = vpop.f32.mrb[3].mxu1 }
 0x1b7   :  { %v155_v22 = vmul.f32 %v211_v19, %v147_v20 }
 0x1b9   :  { %v156_v23 = vsel %vm38_vm0, %v155_v22, 0.0 }
 0x1ba   :  { %157 = vadd.xlane.f32.xlu0 %v156_v23 }
 0x247   :  { %v158_v24 = vpop.xlane.xlu0 %157 }
 0x248   :  { %v159_v25 = vadd.f32 %v205_v6, %v158_v24 }
 0x24a   :  { %161 = vrot.lane.b32.xlu1 %v159_v25, %s241_s4 }
 0x2bc   :  { %v162_v26 = vpop.permute.xlu1 %161 }
 0x2bd   :  { %165 = vst.msk [vmem:[#allocation2] sm:$0xff] %vm164_vm3, %v162_v26 }
 0x2c4   :  { %v183_v27 = vld [vmem:[#allocation2] sm:$0x3] }
 0x2c5   :  { %184 = vst [vmem:[%s300_s5] sm:$0x3] %v183_v27 }

</bundles_post_ra>
